<compile_context>
chip_gen: v7x
topology: tpu7x:2x2x1
jax: 0.10.0
libtpu: 0.0.40
codegen_flags: <defaults>
</compile_context>

<pallas_src>
import jax
import jax.numpy as jnp
from jax.experimental import pallas as pl
from jax.experimental.pallas import tpu as pltpu

hidden_size = 256
input_size = 28
output_size = 10

LANE = 128  # TPU lane width: pad the tiny (10-wide) output projection to this.


def rnn_kernel(x_ref, h0_ref, wih_ref, whh_ref, b_ref, who_ref, bho_ref,
               out_ref, hout_ref, pre_ref):
    # Shapes (all static at trace time):
    #   x_ref   : (T*B, D_in)   time-major, flattened over (T, B)
    #   h0_ref  : (B, H)
    #   wih_ref : (D_in, H)     W_ih^T
    #   whh_ref : (H, H)        W_hh^T
    #   b_ref   : (1, H)        b_ih + b_hh (pre-summed)
    #   who_ref : (H, 128)      W_ho^T zero-padded to lane width
    #   bho_ref : (1, 128)      b_ho   zero-padded to lane width
    #   out_ref : (B, 128)      lane-dense output block
    #   hout_ref: (B, H)
    #   pre_ref : (T*B, H)      VMEM scratch for the hoisted input projection
    B = h0_ref.shape[0]
    TB = x_ref.shape[0]
    T = TB // B

    # --- Prologue: input projection for ALL timesteps in one MXU matmul,  ---
    # --- stashed in VMEM scratch so it is not live across the serial loop.---
    pre_ref[...] = (jnp.dot(x_ref[...], wih_ref[...],
                            preferred_element_type=jnp.float32)
                    + b_ref[...])

    # --- Serial recurrence: only h_prev @ W_hh^T + pre[t], relu per step. ---
    whh = whh_ref[...]                       # hoisted once (256x256 f32)
    h = h0_ref[...]
    for t in range(T):                       # T=8: fully unrolled, static
        pre_t = pre_ref[t * B:(t + 1) * B, :]        # 8-row aligned VMEM load
        h = jnp.maximum(
            pre_t + jnp.dot(h, whh, preferred_element_type=jnp.float32), 0.0)

    # --- Epilogue: final hidden state + lane-dense output projection. ---
    hout_ref[...] = h
    out_ref[...] = (jnp.dot(h, who_ref[...],
                            preferred_element_type=jnp.float32)
                    + bho_ref[...])


def rnn_forward(x, hidden, params):
    """x: (B, T, input_size), hidden: (B, hidden_size). Returns (output, hidden)."""
    w_ih, b_ih, w_hh, b_hh, w_ho, b_ho = params
    B, T, D_in = x.shape
    H = w_ih.shape[0]
    O = w_ho.shape[0]
    O_pad = max(LANE, ((O + LANE - 1) // LANE) * LANE)

    # Time-major, flattened over (T, B) so the input projection is one matmul.
    x_flat = jnp.transpose(x, (1, 0, 2)).reshape(T * B, D_in)
    wih_t = w_ih.T                                          # (D_in, H)
    whh_t = w_hh.T                                          # (H, H)
    b_sum = (b_ih + b_hh).reshape(1, H)                     # pre-summed bias
    # Zero-pad the output projection to lane width for an unmasked store.
    who_t = jnp.zeros((H, O_pad), jnp.float32).at[:, :O].set(w_ho.T)
    bho = jnp.zeros((1, O_pad), jnp.float32).at[:, :O].set(b_ho.reshape(1, O))

    out_pad, h_out = pl.pallas_call(
        rnn_kernel,
        out_shape=(jax.ShapeDtypeStruct((B, O_pad), jnp.float32),
                   jax.ShapeDtypeStruct((B, H), jnp.float32)),
        in_specs=[
            pl.BlockSpec(memory_space=pltpu.VMEM),   # x_flat (T*B, D_in)
            pl.BlockSpec(memory_space=pltpu.VMEM),   # h0
            pl.BlockSpec(memory_space=pltpu.VMEM),   # W_ih^T
            pl.BlockSpec(memory_space=pltpu.VMEM),   # W_hh^T
            pl.BlockSpec(memory_space=pltpu.VMEM),   # b_ih + b_hh
            pl.BlockSpec(memory_space=pltpu.VMEM),   # W_ho^T (lane-padded)
            pl.BlockSpec(memory_space=pltpu.VMEM),   # b_ho   (lane-padded)
        ],
        out_specs=(
            pl.BlockSpec(memory_space=pltpu.VMEM),
            pl.BlockSpec(memory_space=pltpu.VMEM),
        ),
        scratch_shapes=[pltpu.VMEM((T * B, H), jnp.float32)],   # pre_all
    )(x_flat, hidden, wih_t, whh_t, b_sum, who_t, bho)
    return out_pad[:, :O], h_out


def rnn_reference(x, hidden, params):
    """Pure-JAX reference mirroring the PyTorch forward."""
    w_ih, b_ih, w_hh, b_hh, w_ho, b_ho = params
    output = None
    for t in range(x.shape[1]):
        x_t = x[:, t, :]
        hidden = jnp.maximum(x_t @ w_ih.T + b_ih + hidden @ w_hh.T + b_hh, 0.0)
        output = hidden @ w_ho.T + b_ho
    return output, hidden


def init_params(key):
    ks = jax.random.split(key, 6)

    def lin(kw, kb, out_f, in_f):
        bound = 1.0 / jnp.sqrt(in_f)
        w = jax.random.uniform(kw, (out_f, in_f), jnp.float32, -bound, bound)
        b = jax.random.uniform(kb, (out_f,), jnp.float32, -bound, bound)
        return w, b

    w_ih, b_ih = lin(ks[0], ks[1], hidden_size, input_size)
    w_hh, b_hh = lin(ks[2], ks[3], hidden_size, hidden_size)
    w_ho, b_ho = lin(ks[4], ks[5], output_size, hidden_size)
    return (w_ih, b_ih, w_hh, b_hh, w_ho, b_ho)


if __name__ == "__main__":
    key = jax.random.PRNGKey(0)
    k_x, k_h, k_p = jax.random.split(key, 3)

    B, T = 8, 8
    x = jax.random.normal(k_x, (B, T, input_size), jnp.float32)
    hidden0 = jax.random.normal(k_h, (B, hidden_size), jnp.float32)
    params = init_params(k_p)

    out, h_out = rnn_forward(x, hidden0, params)
    out = jax.block_until_ready(out)
    h_out = jax.block_until_ready(h_out)

    ref_out, ref_h = rnn_reference(x, hidden0, params)
    assert out.shape == (B, output_size) and h_out.shape == (B, hidden_size)
    assert jnp.allclose(out, ref_out, atol=1e-4, rtol=1e-4)
    assert jnp.allclose(h_out, ref_h, atol=1e-4, rtol=1e-4)

    print("KERNEL_OK")
</pallas_src>

<mosaic_0001>
module attributes {stable_mosaic.version = 11 : i64} {
  func.func @rnn_kernel(%arg0: memref<64x28xf32, #tpu.memory_space<vmem>>, %arg1: memref<8x256xf32, #tpu.memory_space<vmem>>, %arg2: memref<28x256xf32, #tpu.memory_space<vmem>>, %arg3: memref<256x256xf32, #tpu.memory_space<vmem>>, %arg4: memref<1x256xf32, #tpu.memory_space<vmem>>, %arg5: memref<256x128xf32, #tpu.memory_space<vmem>>, %arg6: memref<1x128xf32, #tpu.memory_space<vmem>>, %arg7: memref<8x128xf32, #tpu.memory_space<vmem>>, %arg8: memref<8x256xf32, #tpu.memory_space<vmem>>, %arg9: memref<64x256xf32, #tpu.memory_space<vmem>>) attributes {dimension_semantics = [], scalar_prefetch = 0 : i64, scratch_operands = 1 : i64, tpu.core_type = #tpu.core_type<tc>} {
    %c0 = arith.constant 0 : index
    %c0_0 = arith.constant 0 : index
    %0 = vector.load %arg0[%c0, %c0_0] : memref<64x28xf32, #tpu.memory_space<vmem>>, vector<64x28xf32>
    %c0_1 = arith.constant 0 : index
    %c0_2 = arith.constant 0 : index
    %1 = vector.load %arg2[%c0_1, %c0_2] : memref<28x256xf32, #tpu.memory_space<vmem>>, vector<28x256xf32>
    %cst = arith.constant dense<0.000000e+00> : vector<64x256xf32>
    %2 = tpu.matmul %0, %1, %cst {dimension_numbers = #tpu.dot_dimension_numbers<[1], [0], [0], [1], [0, 0, 1, 1], [], []>} : vector<64x28xf32>, vector<28x256xf32>, vector<64x256xf32> -> vector<64x256xf32>
    %c0_3 = arith.constant 0 : index
    %c0_4 = arith.constant 0 : index
    %3 = vector.load %arg4[%c0_3, %c0_4] : memref<1x256xf32, #tpu.memory_space<vmem>>, vector<1x256xf32>
    %4 = vector.broadcast %3 : vector<1x256xf32> to vector<64x256xf32>
    %5 = arith.addf %2, %4 : vector<64x256xf32>
    %c0_5 = arith.constant 0 : index
    %c0_6 = arith.constant 0 : index
    %6 = vector.load %arg9[%c0_5, %c0_6] : memref<64x256xf32, #tpu.memory_space<vmem>>, vector<64x256xf32>
    tpu.vector_store %arg9[%c0_5, %c0_6], %5 {strides = array<i32>} : memref<64x256xf32, #tpu.memory_space<vmem>>, vector<64x256xf32>,
    %c0_7 = arith.constant 0 : index
    %c0_8 = arith.constant 0 : index
    %7 = vector.load %arg3[%c0_7, %c0_8] : memref<256x256xf32, #tpu.memory_space<vmem>>, vector<256x256xf32>
    %c0_9 = arith.constant 0 : index
    %c0_10 = arith.constant 0 : index
    %8 = vector.load %arg1[%c0_9, %c0_10] : memref<8x256xf32, #tpu.memory_space<vmem>>, vector<8x256xf32>
    %c0_11 = arith.constant 0 : index
    %c0_12 = arith.constant 0 : index
    %9 = vector.load %arg9[%c0_11, %c0_12] : memref<64x256xf32, #tpu.memory_space<vmem>>, vector<8x256xf32>
    %cst_13 = arith.constant dense<0.000000e+00> : vector<8x256xf32>
    %10 = tpu.matmul %8, %7, %cst_13 {dimension_numbers = #tpu.dot_dimension_numbers<[1], [0], [0], [1], [0, 0, 1, 1], [], []>} : vector<8x256xf32>, vector<256x256xf32>, vector<8x256xf32> -> vector<8x256xf32>
    %11 = arith.addf %9, %10 : vector<8x256xf32>
    %cst_14 = arith.constant 0.000000e+00 : f32
    %12 = vector.broadcast %cst_14 : f32 to vector<8x256xf32>
    %13 = arith.maximumf %11, %12 : vector<8x256xf32>
    %c8 = arith.constant 8 : index
    %c0_15 = arith.constant 0 : index
    %14 = vector.load %arg9[%c8, %c0_15] : memref<64x256xf32, #tpu.memory_space<vmem>>, vector<8x256xf32>
    %cst_16 = arith.constant dense<0.000000e+00> : vector<8x256xf32>
    %15 = tpu.matmul %13, %7, %cst_16 {dimension_numbers = #tpu.dot_dimension_numbers<[1], [0], [0], [1], [0, 0, 1, 1], [], []>} : vector<8x256xf32>, vector<256x256xf32>, vector<8x256xf32> -> vector<8x256xf32>
    %16 = arith.addf %14, %15 : vector<8x256xf32>
    %cst_17 = arith.constant 0.000000e+00 : f32
    %17 = vector.broadcast %cst_17 : f32 to vector<8x256xf32>
    %18 = arith.maximumf %16, %17 : vector<8x256xf32>
    %c16 = arith.constant 16 : index
    %c0_18 = arith.constant 0 : index
    %19 = vector.load %arg9[%c16, %c0_18] : memref<64x256xf32, #tpu.memory_space<vmem>>, vector<8x256xf32>
    %cst_19 = arith.constant dense<0.000000e+00> : vector<8x256xf32>
    %20 = tpu.matmul %18, %7, %cst_19 {dimension_numbers = #tpu.dot_dimension_numbers<[1], [0], [0], [1], [0, 0, 1, 1], [], []>} : vector<8x256xf32>, vector<256x256xf32>, vector<8x256xf32> -> vector<8x256xf32>
    %21 = arith.addf %19, %20 : vector<8x256xf32>
    %cst_20 = arith.constant 0.000000e+00 : f32
    %22 = vector.broadcast %cst_20 : f32 to vector<8x256xf32>
    %23 = arith.maximumf %21, %22 : vector<8x256xf32>
    %c24 = arith.constant 24 : index
    %c0_21 = arith.constant 0 : index
    %24 = vector.load %arg9[%c24, %c0_21] : memref<64x256xf32, #tpu.memory_space<vmem>>, vector<8x256xf32>
    %cst_22 = arith.constant dense<0.000000e+00> : vector<8x256xf32>
    %25 = tpu.matmul %23, %7, %cst_22 {dimension_numbers = #tpu.dot_dimension_numbers<[1], [0], [0], [1], [0, 0, 1, 1], [], []>} : vector<8x256xf32>, vector<256x256xf32>, vector<8x256xf32> -> vector<8x256xf32>
    %26 = arith.addf %24, %25 : vector<8x256xf32>
    %cst_23 = arith.constant 0.000000e+00 : f32
    %27 = vector.broadcast %cst_23 : f32 to vector<8x256xf32>
    %28 = arith.maximumf %26, %27 : vector<8x256xf32>
    %c32 = arith.constant 32 : index
    %c0_24 = arith.constant 0 : index
    %29 = vector.load %arg9[%c32, %c0_24] : memref<64x256xf32, #tpu.memory_space<vmem>>, vector<8x256xf32>
    %cst_25 = arith.constant dense<0.000000e+00> : vector<8x256xf32>
    %30 = tpu.matmul %28, %7, %cst_25 {dimension_numbers = #tpu.dot_dimension_numbers<[1], [0], [0], [1], [0, 0, 1, 1], [], []>} : vector<8x256xf32>, vector<256x256xf32>, vector<8x256xf32> -> vector<8x256xf32>
    %31 = arith.addf %29, %30 : vector<8x256xf32>
    %cst_26 = arith.constant 0.000000e+00 : f32
    %32 = vector.broadcast %cst_26 : f32 to vector<8x256xf32>
    %33 = arith.maximumf %31, %32 : vector<8x256xf32>
    %c40 = arith.constant 40 : index
    %c0_27 = arith.constant 0 : index
    %34 = vector.load %arg9[%c40, %c0_27] : memref<64x256xf32, #tpu.memory_space<vmem>>, vector<8x256xf32>
    %cst_28 = arith.constant dense<0.000000e+00> : vector<8x256xf32>
    %35 = tpu.matmul %33, %7, %cst_28 {dimension_numbers = #tpu.dot_dimension_numbers<[1], [0], [0], [1], [0, 0, 1, 1], [], []>} : vector<8x256xf32>, vector<256x256xf32>, vector<8x256xf32> -> vector<8x256xf32>
    %36 = arith.addf %34, %35 : vector<8x256xf32>
    %cst_29 = arith.constant 0.000000e+00 : f32
    %37 = vector.broadcast %cst_29 : f32 to vector<8x256xf32>
    %38 = arith.maximumf %36, %37 : vector<8x256xf32>
    %c48 = arith.constant 48 : index
    %c0_30 = arith.constant 0 : index
    %39 = vector.load %arg9[%c48, %c0_30] : memref<64x256xf32, #tpu.memory_space<vmem>>, vector<8x256xf32>
    %cst_31 = arith.constant dense<0.000000e+00> : vector<8x256xf32>
    %40 = tpu.matmul %38, %7, %cst_31 {dimension_numbers = #tpu.dot_dimension_numbers<[1], [0], [0], [1], [0, 0, 1, 1], [], []>} : vector<8x256xf32>, vector<256x256xf32>, vector<8x256xf32> -> vector<8x256xf32>
    %41 = arith.addf %39, %40 : vector<8x256xf32>
    %cst_32 = arith.constant 0.000000e+00 : f32
    %42 = vector.broadcast %cst_32 : f32 to vector<8x256xf32>
    %43 = arith.maximumf %41, %42 : vector<8x256xf32>
    %c56 = arith.constant 56 : index
    %c0_33 = arith.constant 0 : index
    %44 = vector.load %arg9[%c56, %c0_33] : memref<64x256xf32, #tpu.memory_space<vmem>>, vector<8x256xf32>
    %cst_34 = arith.constant dense<0.000000e+00> : vector<8x256xf32>
    %45 = tpu.matmul %43, %7, %cst_34 {dimension_numbers = #tpu.dot_dimension_numbers<[1], [0], [0], [1], [0, 0, 1, 1], [], []>} : vector<8x256xf32>, vector<256x256xf32>, vector<8x256xf32> -> vector<8x256xf32>
    %46 = arith.addf %44, %45 : vector<8x256xf32>
    %cst_35 = arith.constant 0.000000e+00 : f32
    %47 = vector.broadcast %cst_35 : f32 to vector<8x256xf32>
    %48 = arith.maximumf %46, %47 : vector<8x256xf32>
    %c0_36 = arith.constant 0 : index
    %c0_37 = arith.constant 0 : index
    %49 = vector.load %arg8[%c0_36, %c0_37] : memref<8x256xf32, #tpu.memory_space<vmem>>, vector<8x256xf32>
    tpu.vector_store %arg8[%c0_36, %c0_37], %48 {strides = array<i32>} : memref<8x256xf32, #tpu.memory_space<vmem>>, vector<8x256xf32>,
    %c0_38 = arith.constant 0 : index
    %c0_39 = arith.constant 0 : index
    %50 = vector.load %arg5[%c0_38, %c0_39] : memref<256x128xf32, #tpu.memory_space<vmem>>, vector<256x128xf32>
    %cst_40 = arith.constant dense<0.000000e+00> : vector<8x128xf32>
    %51 = tpu.matmul %48, %50, %cst_40 {dimension_numbers = #tpu.dot_dimension_numbers<[1], [0], [0], [1], [0, 0, 1, 1], [], []>} : vector<8x256xf32>, vector<256x128xf32>, vector<8x128xf32> -> vector<8x128xf32>
    %c0_41 = arith.constant 0 : index
    %c0_42 = arith.constant 0 : index
    %52 = vector.load %arg6[%c0_41, %c0_42] : memref<1x128xf32, #tpu.memory_space<vmem>>, vector<1x128xf32>
    %53 = vector.broadcast %52 : vector<1x128xf32> to vector<8x128xf32>
    %54 = arith.addf %51, %53 : vector<8x128xf32>
    %c0_43 = arith.constant 0 : index
    %c0_44 = arith.constant 0 : index
    %55 = vector.load %arg7[%c0_43, %c0_44] : memref<8x128xf32, #tpu.memory_space<vmem>>, vector<8x128xf32>
    tpu.vector_store %arg7[%c0_43, %c0_44], %54 {strides = array<i32>} : memref<8x128xf32, #tpu.memory_space<vmem>>, vector<8x128xf32>,
    return
  }
}

</mosaic_0001>

<bundles_post_ra>
// kernel: tpu_custom_call.1
= control target key start
LH: loop header
LB: loop body
LE: loop exit
PB: predicated region body
PF: predicated region fallthrough
CT: control target
= control target key end

     0   :  { %14 = vsyncpa [#allocation4], 0  ;;  %s2336_s0 = inlined_call_operand.vmem [shape: f32[64,28], index: 0, kind: input, shape index: {}]   ;;  %s2337_s1 = inlined_call_operand.vmem [shape: f32[8,256], index: 1, kind: input, shape index: {}]   ;;  %s2338_s2 = inlined_call_operand.vmem [shape: f32[28,256], index: 2, kind: input, shape index: {}]   ;;  %s2339_s3 = inlined_call_operand.hbm [shape: f32[256,256], index: 3, kind: input, shape index: {}]   ;;  %s2340_s4 = inlined_call_operand.vmem [shape: f32[1,256], index: 4, kind: input, shape index: {}]   ;;  %s2341_s5 = inlined_call_operand.hbm [shape: f32[256,128], index: 5, kind: input, shape index: {}]   ;;  %s2342_s6 = inlined_call_operand.vmem [shape: f32[1,128], index: 6, kind: input, shape index: {}]   ;;  %s2343_s7 = inlined_call_operand.hbm [shape: f32[8,128], index: 7, kind: output, shape index: {0}]   ;;  %s2344_s8 = inlined_call_operand.hbm [shape: f32[8,256], index: 8, kind: output, shape index: {1}]  }
   0x1   :  { %15 = vsyncpa [#allocation7], 0 }
   0x2   :  { %16 = vsyncpa [#allocation5], 0 }
   0x3   :  { %17 = vsyncpa [#allocation10], 0  ;;  %s1809_s27 = smov [#allocation3]   ;;  %s1713_s9 = scalar_lea.hbm %s2339_s3, 8192 }
   0x4   :  { %s29_s28 = sshll.u32 %s1809_s27, 4  ;;  %p1714_p0 = scmp.ne.s32.totalorder %s2339_s3, %s1713_s9  ;;  %s30_s28 = int_to_ptr.vmem [resolvable:$true] %s29_s28 }
   0x5   :  { %p1717_p1 = scmp.lt.u32.totalorder %s1713_s9, %s2339_s3 }
   0x7   :  { %p1719_p2 = pnand %p1717_p1, %p1714_p0 }
   0x9   :  { %1722 = shalt.err (!%p1719_p2)
}
   0xa   :  { %s1723_s14 = scalar_lea.vmem %s30_s28, 8192  ;;  %p1728_p4 = scmp.lt.s32.totalorder %s30_s28, %s30_s28 }
   0xb   :  { %p1724_p3 = scmp.ne.s32.totalorder %s30_s28, %s1723_s14  ;;  %p1729_p5 = scmp.lt.s32.totalorder %s1723_s14, %s1723_s14 }
   0xd   :  { %p1730_p6 = por %p1729_p5, %p1728_p4 }
   0xf   :  { %p1731_p7 = pnand %p1730_p6, %p1724_p3 }
  0x11   :  { %1734 = shalt.err (!%p1731_p7)
}
  0x12   :  { %s1810_s15 = smov 256   ;;  %s1811_s16 = smov 16  }
  0x13   :  { %35 = dma.hbm_to_vmem [thread:$0]  %s2339_s3, 8192, %s30_s28, [#allocation4], %s1810_s15, %s1810_s15, %s1811_s16  }
  0x14   :  { %s1812_s19 = smov [#allocation6]   ;;  %s1735_s23 = scalar_lea.hbm %s2341_s5, 4096 }
  0x15   :  { %s43_s20 = sshll.u32 %s1812_s19, 4  ;;  %p1736_p8 = scmp.ne.s32.totalorder %s2341_s5, %s1735_s23  ;;  %s44_s20 = int_to_ptr.vmem [resolvable:$true] %s43_s20 }
  0x16   :  { %p1739_p9 = scmp.lt.u32.totalorder %s1735_s23, %s2341_s5 }
  0x18   :  { %p1741_p10 = pnand %p1739_p9, %p1736_p8 }
  0x1a   :  { %1744 = shalt.err (!%p1741_p10)
}
  0x1b   :  { %s1745_s29 = scalar_lea.vmem %s44_s20, 4096  ;;  %p1750_p12 = scmp.lt.s32.totalorder %s44_s20, %s44_s20 }
  0x1c   :  { %p1746_p11 = scmp.ne.s32.totalorder %s44_s20, %s1745_s29  ;;  %p1751_p13 = scmp.lt.s32.totalorder %s1745_s29, %s1745_s29 }
  0x1e   :  { %p1752_p0 = por %p1751_p13, %p1750_p12 }
  0x20   :  { %p1753_p1 = pnand %p1752_p0, %p1746_p11 }
  0x22   :  { %1756 = shalt.err (!%p1753_p1)
}
  0x23   :  { %s1813_s3 = smov 128   ;;  %s1814_s28 = smov 8  }
  0x24   :  { %49 = dma.hbm_to_vmem [thread:$0]  %s2341_s5, 4096, %s44_s20, [#allocation7], %s1813_s3, %s1813_s3, %s1814_s28  }
  0x25   :  { %1801 = dma.done.wait [#allocation4], 8192  }
  0x26   :  { %1802 = vsyncadd [#allocation4], 4294959104 }
  0x27   :  { %1803 = dma.done.wait [#allocation7], 4096  }
  0x28   :  { %1804 = vsyncadd [#allocation7], 4294963200  ;;  %v1815_v0 = vmov 0.0   ;;  %v248_v1 = vld [vmem:[#allocation3 + $0x8] sm:$0xff]  ;;  %v250_v2 = vld [vmem:[#allocation3 + $0x18] sm:$0xff]  ;;  %vm111_vm0 = vcmask 1043456  }
  0x29   :  { %182 = vmatprep.mubr.f32.mxu0 %v1815_v0  ;;  %v247_v3 = vld [vmem:[#allocation3] sm:$0xff]  ;;  %v1889_v4 = vpack.c.bf16 %v250_v2, %v248_v1  ;;  %v249_v5 = vld [vmem:[#allocation3 + $0x10] sm:$0xff]  ;;  %v252_v6 = vld [vmem:[#allocation3 + $0x28] sm:$0xff]  ;;  %vm1816_vm1 = vmmov 1   ;;  %vm86_vm3 = vcmask 228352  }
  0x2a   :  { %v254_v7 = vld [vmem:[#allocation3 + $0x38] sm:$0xff]  ;;  %v1891_v8 = vpack.c.bf16 %v249_v5, %v247_v3  ;;  %v251_v10 = vld [vmem:[#allocation3 + $0x20] sm:$0xff]  ;;  %v253_v11 = vld [vmem:[#allocation3 + $0x30] sm:$0xff] }
  0x2b   :  { %v1893_v9 = vpack.c.bf16 %v254_v7, %v252_v6  ;;  %v256_v12 = vld [vmem:[#allocation3 + $0x48] sm:$0xff]  ;;  %1128 = vmatprep.subr.bf16.mxu1 %v1889_v4  ;;  %v258_v13 = vld [vmem:[#allocation3 + $0x58] sm:$0xff]  ;;  %v1897_v14 = vpack.c.bf16 %v253_v11, %v251_v10  ;;  %v255_v16 = vld [vmem:[#allocation3 + $0x40] sm:$0xff] }
  0x2c   :  { %1130 = vmatpush1.bf16.msra.mxu1 %v1891_v8  ;;  %v1900_v15 = vpack.c.bf16 %v258_v13, %v256_v12  ;;  %v257_v17 = vld [vmem:[#allocation3 + $0x50] sm:$0xff]  ;;  %v260_v18 = vld [vmem:[#allocation3 + $0x68] sm:$0xff]  ;;  %v262_v19 = vld [vmem:[#allocation3 + $0x78] sm:$0xff] }
  0x2d   :  { %1132 = vmatprep.subr.bf16.mxu1 %v1893_v9  ;;  %v1903_v20 = vpack.c.bf16 %v257_v17, %v255_v16  ;;  %v1906_v21 = vpack.c.bf16 %v262_v19, %v260_v18  ;;  %v259_v22 = vld [vmem:[#allocation3 + $0x60] sm:$0xff]  ;;  %v261_v23 = vld [vmem:[#allocation3 + $0x70] sm:$0xff]  ;;  %v264_v24 = vld [vmem:[#allocation3 + $0x88] sm:$0xff] }
  0x2e   :  { %v266_v25 = vld [vmem:[#allocation3 + $0x98] sm:$0xff]  ;;  %v1909_v26 = vpack.c.bf16 %v261_v23, %v259_v22  ;;  %v263_v28 = vld [vmem:[#allocation3 + $0x80] sm:$0xff]  ;;  %v265_v29 = vld [vmem:[#allocation3 + $0x90] sm:$0xff] }
  0x2f   :  { %v1912_v27 = vpack.c.bf16 %v266_v25, %v264_v24  ;;  %v268_v30 = vld [vmem:[#allocation3 + $0xa8] sm:$0xff]  ;;  %v270_v31 = vld [vmem:[#allocation3 + $0xb8] sm:$0xff]  ;;  %v1915_v32 = vpack.c.bf16 %v265_v29, %v263_v28  ;;  %v267_v34 = vld [vmem:[#allocation3 + $0xa0] sm:$0xff] }
  0x30   :  { %1134 = vmatpush1.bf16.msra.mxu1 %v1897_v14  ;;  %v1918_v33 = vpack.c.bf16 %v270_v31, %v268_v30  ;;  %v269_v35 = vld [vmem:[#allocation3 + $0xb0] sm:$0xff]  ;;  %v272_v36 = vld [vmem:[#allocation3 + $0xc8] sm:$0xff]  ;;  %v274_v37 = vld [vmem:[#allocation3 + $0xd8] sm:$0xff] }
  0x31   :  { %1136 = vmatprep.subr.bf16.mxu1 %v1900_v15  ;;  %v67_v38 = vld [vmem:[%s2338_s2 + $0x8] sm:$0xff]  ;;  %v69_v39 = vld [vmem:[%s2338_s2 + $0x18] sm:$0xff]  ;;  %v66_v41 = vld [vmem:[%s2338_s2] sm:$0xff]  ;;  %v1933_v43 = vpack.c.bf16 %v269_v35, %v267_v34  ;;  %v1943_v48 = vpack.c.bf16 %v274_v37, %v272_v36 }
  0x32   :  { %v1117_v40 = vpack.c.bf16 %v69_v39, %v67_v38  ;;  %v68_v42 = vld [vmem:[%s2338_s2 + $0x10] sm:$0xff]  ;;  %v271_v44 = vld [vmem:[#allocation3 + $0xc0] sm:$0xff]  ;;  %v71_v46 = vld [vmem:[%s2338_s2 + $0x28] sm:$0xff] }
  0x33   :  { %v1119_v45 = vpack.c.bf16 %v68_v42, %v66_v41  ;;  %vm1938_vm2 = vmpackc.low %vm111_vm0, %vm1816_vm1  ;;  %v273_v49 = vld [vmem:[#allocation3 + $0xd0] sm:$0xff]  ;;  %v276_v50 = vld [vmem:[#allocation3 + $0xe8] sm:$0xff] }
  0x34   :  { %1138 = vmatpush1.bf16.msra.mxu1 %v1903_v20  ;;  %1118 = vmatprep.subr.bf16.mxu0 %v1117_v40  ;;  %v73_v51 = vld [vmem:[%s2338_s2 + $0x38] sm:$0xf]  ;;  %v70_v54 = vld [vmem:[%s2338_s2 + $0x20] sm:$0xff]  ;;  %v72_v55 = vld [vmem:[%s2338_s2 + $0x30] sm:$0xf]  ;;  %v1955_v57 = vpack.c.bf16 %v273_v49, %v271_v44 }
  0x35   :  { %1140 = vmatprep.subr.bf16.mxu1 %v1906_v21  ;;  %v278_v52 = vld [vmem:[#allocation3 + $0xf8] sm:$0xff]  ;;  %1120 = vmatpush1.bf16.msra.mxu0 %v1119_v45  ;;  %v1121_v53 = vpack.c.bf16 %v73_v51, %v71_v46  ;;  %v1124_v56 = vpack.c.bf16 %v72_v55, %v70_v54  ;;  %v312_v58 = vld [vmem:[%s2337_s1 + $0x8] sm:$0xff]  ;;  %v275_v60 = vld [vmem:[#allocation3 + $0xe0] sm:$0xff] }
  0x36   :  { %v1963_v59 = vpack.c.bf16 %v278_v52, %v276_v50  ;;  %v277_v61 = vld [vmem:[#allocation3 + $0xf0] sm:$0xff]  ;;  %379 = vmatprep.mubr.f32.mxu1 %v312_v58  ;;  %v280_v62 = vld [vmem:[#allocation3 + $0x108] sm:$0xff]  ;;  %v282_v63 = vld [vmem:[#allocation3 + $0x118] sm:$0xff] }
  0x37   :  { %1123 = vmatprep.subr.msk.bf16.mxu0 %vm1938_vm2, %v1121_v53  ;;  %v58_v1 = vld [vmem:[%s2336_s0] sm:$0xff]  ;;  %v1972_v2 = vpack.c.bf16 %v277_v61, %v275_v60  ;;  %v1975_v3 = vpack.c.bf16 %v282_v63, %v280_v62  ;;  %v281_v6 = vld [vmem:[#allocation3 + $0x110] sm:$0xff]  ;;  %v284_v7 = vld [vmem:[#allocation3 + $0x128] sm:$0xff] }
  0x38   :  { %1142 = vmatpush1.bf16.msra.mxu1 %v1909_v26  ;;  %v279_v5 = vld [vmem:[#allocation3 + $0x100] sm:$0xff]  ;;  %v286_v10 = vld [vmem:[#allocation3 + $0x138] sm:$0xff]  ;;  %v285_v16 = vld [vmem:[#allocation3 + $0x130] sm:$0xff] }
  0x39   :  { %1144 = vmatprep.subr.bf16.mxu1 %v1912_v27  ;;  %1126 = vmatpush1.bf16.msk.msra.mxu0 %vm1938_vm2, %v1124_v56  ;;  %v1982_v11 = vpack.c.bf16 %v281_v6, %v279_v5  ;;  %v1985_v12 = vpack.c.bf16 %v286_v10, %v284_v7  ;;  %v283_v13 = vld [vmem:[#allocation3 + $0x120] sm:$0xff]  ;;  %v288_v17 = vld [vmem:[#allocation3 + $0x148] sm:$0xff]  ;;  %v290_v18 = vld [vmem:[#allocation3 + $0x158] sm:$0xff]  ;;  %v76_v10 = vlaneseq }
  0x3a   :  { %1384 = vmatprep.subr.bf16.mxu0 %v1889_v4  ;;  %v1990_v19 = vpack.c.bf16 %v285_v16, %v283_v13  ;;  %v1993_v22 = vpack.c.bf16 %v290_v18, %v288_v17  ;;  %v287_v23 = vld [vmem:[#allocation3 + $0x140] sm:$0xff]  ;;  %v289_v24 = vld [vmem:[#allocation3 + $0x150] sm:$0xff]  ;;  %v292_v25 = vld [vmem:[#allocation3 + $0x168] sm:$0xff] }
  0x3b   :  { %v294_v28 = vld [vmem:[#allocation3 + $0x178] sm:$0xff]  ;;  %v1998_v29 = vpack.c.bf16 %v289_v24, %v287_v23  ;;  %v291_v31 = vld [vmem:[#allocation3 + $0x160] sm:$0xff]  ;;  %v293_v34 = vld [vmem:[#allocation3 + $0x170] sm:$0xff]  ;;  %v77_v13 = vshrl.u32 %v76_v10, 7 }
  0x3c   :  { %1146 = vmatpush1.bf16.msra.mxu1 %v1915_v32  ;;  %1073 = vmatmul.mubr.msk.f32.vlgmr.msra.gmra.mrb[0].mxu0 %vm86_vm3, %v58_v1  ;;  %v2001_v30 = vpack.c.bf16 %v294_v28, %v292_v25  ;;  %v296_v35 = vld [vmem:[#allocation3 + $0x188] sm:$0xff]  ;;  %v298_v36 = vld [vmem:[#allocation3 + $0x198] sm:$0xff]  ;;  %v2006_v37 = vpack.c.bf16 %v293_v34, %v291_v31  ;;  %v295_v39 = vld [vmem:[#allocation3 + $0x180] sm:$0xff] }
  0x3d   :  { %1148 = vmatprep.subr.bf16.mxu1 %v1918_v33  ;;  %188 = vmatprep.mubr.f32.mxu0 %v1815_v0  ;;  %v2009_v38 = vpack.c.bf16 %v298_v36, %v296_v35  ;;  %v297_v40 = vld [vmem:[#allocation3 + $0x190] sm:$0xff]  ;;  %v300_v41 = vld [vmem:[#allocation3 + $0x1a8] sm:$0xff]  ;;  %v302_v42 = vld [vmem:[#allocation3 + $0x1b8] sm:$0xff]  ;;  %v78_v16 = vsub.s32 0, %v77_v13  ;;  %v82_v18 = vsub.s32 1, %v77_v13 }
  0x3e   :  { %1386 = vmatpush1.bf16.msra.mxu0 %v1891_v8  ;;  %v2014_v44 = vpack.c.bf16 %v297_v40, %v295_v39  ;;  %v2017_v45 = vpack.c.bf16 %v302_v42, %v300_v41  ;;  %v299_v46 = vld [vmem:[#allocation3 + $0x1a0] sm:$0xff]  ;;  %v301_v47 = vld [vmem:[#allocation3 + $0x1b0] sm:$0xff]  ;;  %v304_v49 = vld [vmem:[#allocation3 + $0x1c8] sm:$0xff] }
  0x3f   :  { %1388 = vmatprep.subr.bf16.mxu0 %v1893_v9  ;;  %v306_v50 = vld [vmem:[#allocation3 + $0x1d8] sm:$0xff]  ;;  %v2022_v51 = vpack.c.bf16 %v301_v47, %v299_v46  ;;  %v303_v53 = vld [vmem:[#allocation3 + $0x1c0] sm:$0xff]  ;;  %v305_v54 = vld [vmem:[#allocation3 + $0x1d0] sm:$0xff] }
  0x40   :  { %1150 = vmatpush1.bf16.msra.mxu1 %v1933_v43  ;;  %v2025_v52 = vpack.c.bf16 %v306_v50, %v304_v49  ;;  %v308_v55 = vld [vmem:[#allocation3 + $0x1e8] sm:$0xff]  ;;  %v310_v56 = vld [vmem:[#allocation3 + $0x1f8] sm:$0xff]  ;;  %v2030_v58 = vpack.c.bf16 %v305_v54, %v303_v53  ;;  %v307_v61 = vld [vmem:[#allocation3 + $0x1e0] sm:$0xff] }
  0x41   :  { %1152 = vmatprep.subr.bf16.mxu1 %v1943_v48  ;;  %v2033_v60 = vpack.c.bf16 %v310_v56, %v308_v55  ;;  %v309_v62 = vld [vmem:[#allocation3 + $0x1f0] sm:$0xff]  ;;  %v311_v1 = vld [vmem:[%s2337_s1] sm:$0xff]  ;;  %v59_v5 = vld [vmem:[%s2336_s0 + $0x8] sm:$0xff] }
  0x42   :  { %1390 = vmatpush1.bf16.msra.mxu0 %v1897_v14  ;;  %v2038_v63 = vpack.c.bf16 %v309_v62, %v307_v61  ;;  %v74_v17 = vld [vmem:[%s2340_s4] sm:$0x3]  ;;  %v60_v46 = vld [vmem:[%s2336_s0 + $0x10] sm:$0xff] }
  0x43   :  { %1392 = vmatprep.subr.bf16.mxu0 %v1900_v15  ;;  %1074 = vmatmul.mubr.msk.f32.gmra.mrb[2].mxu0 %vm86_vm3, %v59_v5  ;;  %v2102_v23 = vrot.slane %v74_v17, %v78_v16  ;;  %v2104_v24 = vrot.slane %v74_v17, %v82_v18  ;;  %v61_v5 = vld [vmem:[%s2336_s0 + $0x18] sm:$0xff]  ;;  %v64_v10 = vld [vmem:[%s2336_s0 + $0x30] sm:$0xff] }
  0x44   :  { %1154 = vmatpush1.bf16.msra.mxu1 %v1955_v57  ;;  %194 = vmatprep.mubr.f32.mxu0 %v1815_v0 }
  0x45   :  { %1156 = vmatprep.subr.bf16.mxu1 %v1963_v59 }
  0x46   :  { %1394 = vmatpush1.bf16.msra.mxu0 %v1903_v20 }
  0x47   :  { %1396 = vmatprep.subr.bf16.mxu0 %v1906_v21  ;;  %1075 = vmatmul.mubr.msk.f32.gmra.mrb[4].mxu0 %vm86_vm3, %v60_v46 }
  0x48   :  { %1158 = vmatpush1.bf16.msra.mxu1 %v1972_v2  ;;  %200 = vmatprep.mubr.f32.mxu0 %v1815_v0 }
  0x49   :  { %1160 = vmatprep.subr.bf16.mxu1 %v1975_v3 }
  0x4a   :  { %1398 = vmatpush1.bf16.msra.mxu0 %v1909_v26 }
  0x4b   :  { %1400 = vmatprep.subr.bf16.mxu0 %v1912_v27  ;;  %1076 = vmatmul.mubr.msk.f32.gmra.mrb[6].mxu0 %vm86_vm3, %v61_v5 }
  0x4c   :  { %1162 = vmatpush1.bf16.msra.mxu1 %v1982_v11  ;;  %206 = vmatprep.mubr.f32.mxu0 %v1815_v0 }
  0x4d   :  { %1164 = vmatprep.subr.bf16.mxu1 %v1985_v12 }
  0x4e   :  { %1402 = vmatpush1.bf16.msra.mxu0 %v1915_v32 }
  0x4f   :  { %1404 = vmatprep.subr.bf16.mxu0 %v1918_v33 }
  0x50   :  { %1166 = vmatpush1.bf16.msra.mxu1 %v1990_v19 }
  0x51   :  { %1168 = vmatprep.subr.bf16.mxu1 %v1993_v22 }
  0x52   :  { %1406 = vmatpush1.bf16.msra.mxu0 %v1933_v43 }
  0x53   :  { %1408 = vmatprep.subr.bf16.mxu0 %v1943_v48 }
  0x54   :  { %1170 = vmatpush1.bf16.msra.mxu1 %v1998_v29 }
  0x55   :  { %1172 = vmatprep.subr.bf16.mxu1 %v2001_v30 }
  0x56   :  { %1410 = vmatpush1.bf16.msra.mxu0 %v1955_v57 }
  0x57   :  { %1412 = vmatprep.subr.bf16.mxu0 %v1963_v59 }
  0x58   :  { %1174 = vmatpush1.bf16.msra.mxu1 %v2006_v37 }
  0x59   :  { %1176 = vmatprep.subr.bf16.mxu1 %v2009_v38 }
  0x5a   :  { %1414 = vmatpush1.bf16.msra.mxu0 %v1972_v2 }
  0x5b   :  { %1416 = vmatprep.subr.bf16.mxu0 %v1975_v3 }
  0x5c   :  { %1178 = vmatpush1.bf16.msra.mxu1 %v2014_v44 }
  0x5d   :  { %1180 = vmatprep.subr.bf16.mxu1 %v2017_v45 }
  0x5e   :  { %1418 = vmatpush1.bf16.msra.mxu0 %v1982_v11 }
  0x5f   :  { %1420 = vmatprep.subr.bf16.mxu0 %v1985_v12 }
  0x60   :  { %1182 = vmatpush1.bf16.msra.mxu1 %v2022_v51 }
  0x61   :  { %1184 = vmatprep.subr.bf16.mxu1 %v2025_v52 }
  0x62   :  { %1422 = vmatpush1.bf16.msra.mxu0 %v1990_v19 }
  0x63   :  { %1424 = vmatprep.subr.bf16.mxu0 %v1993_v22 }
  0x64   :  { %1186 = vmatpush1.bf16.msra.mxu1 %v2030_v58 }
  0x65   :  { %1188 = vmatprep.subr.bf16.mxu1 %v2033_v60 }
  0x66   :  { %1426 = vmatpush1.bf16.msra.mxu0 %v1998_v29 }
  0x67   :  { %1428 = vmatprep.subr.bf16.mxu0 %v2001_v30 }
  0x68   :  { %1190 = vmatpush1.bf16.msra.mxu1 %v2038_v63 }
  0x69   :  { %1192 = vmatprep.subr.bf16.mxu1 %v1889_v4 }
  0x6a   :  { %1430 = vmatpush1.bf16.msra.mxu0 %v2006_v37 }
  0x6b   :  { %380 = vmatmul.mubr.f32.vlgmr.msra.gmra.mrb[0].mxu1 %v311_v1  ;;  %1432 = vmatprep.subr.bf16.mxu0 %v2009_v38 }
  0x6c   :  { %1194 = vmatpush1.bf16.msra.mxu1 %v1891_v8 }
  0x6d   :  { %1196 = vmatprep.subr.bf16.mxu1 %v1893_v9 }
  0x6e   :  { %1434 = vmatpush1.bf16.msra.mxu0 %v2014_v44 }
  0x6f   :  { %1436 = vmatprep.subr.bf16.mxu0 %v2017_v45 }
  0x70   :  { %1198 = vmatpush1.bf16.msra.mxu1 %v1897_v14 }
  0x71   :  { %1200 = vmatprep.subr.bf16.mxu1 %v1900_v15 }
  0x72   :  { %1438 = vmatpush1.bf16.msra.mxu0 %v2022_v51 }
  0x73   :  { %1440 = vmatprep.subr.bf16.mxu0 %v2025_v52 }
  0x74   :  { %1202 = vmatpush1.bf16.msra.mxu1 %v1903_v20 }
  0x75   :  { %1204 = vmatprep.subr.bf16.mxu1 %v1906_v21 }
  0x76   :  { %1442 = vmatpush1.bf16.msra.mxu0 %v2030_v58 }
  0x77   :  { %1444 = vmatprep.subr.bf16.mxu0 %v2033_v60 }
  0x78   :  { %1206 = vmatpush1.bf16.msra.mxu1 %v1909_v26 }
  0x79   :  { %1208 = vmatprep.subr.bf16.mxu1 %v1912_v27 }
  0x7a   :  { %1446 = vmatpush1.bf16.msra.mxu0 %v2038_v63 }
  0x7b   :  { %1448 = vmatprep.subr.bf16.mxu0 %v1889_v4 }
  0x7c   :  { %1210 = vmatpush1.bf16.msra.mxu1 %v1915_v32 }
  0x7d   :  { %1212 = vmatprep.subr.bf16.mxu1 %v1918_v33 }
  0x80   :  { %1214 = vmatpush1.bf16.msra.mxu1 %v1933_v43 }
  0x81   :  { %1216 = vmatprep.subr.bf16.mxu1 %v1943_v48 }
  0x84   :  { %1218 = vmatpush1.bf16.msra.mxu1 %v1955_v57 }
  0x85   :  { %1220 = vmatprep.subr.bf16.mxu1 %v1963_v59 }
  0x88   :  { %1222 = vmatpush1.bf16.msra.mxu1 %v1972_v2 }
  0x89   :  { %1224 = vmatprep.subr.bf16.mxu1 %v1975_v3 }
  0x8c   :  { %1226 = vmatpush1.bf16.msra.mxu1 %v1982_v11 }
  0x8d   :  { %1228 = vmatprep.subr.bf16.mxu1 %v1985_v12 }
  0x90   :  { %1230 = vmatpush1.bf16.msra.mxu1 %v1990_v19 }
  0x91   :  { %1232 = vmatprep.subr.bf16.mxu1 %v1993_v22 }
  0x94   :  { %1234 = vmatpush1.bf16.msra.mxu1 %v1998_v29 }
  0x95   :  { %1236 = vmatprep.subr.bf16.mxu1 %v2001_v30 }
  0x98   :  { %1238 = vmatpush1.bf16.msra.mxu1 %v2006_v37 }
  0x99   :  { %1240 = vmatprep.subr.bf16.mxu1 %v2009_v38 }
  0x9c   :  { %1242 = vmatpush1.bf16.msra.mxu1 %v2014_v44 }
  0x9d   :  { %1244 = vmatprep.subr.bf16.mxu1 %v2017_v45 }
  0xa0   :  { %1246 = vmatpush1.bf16.msra.mxu1 %v2022_v51 }
  0xa1   :  { %1248 = vmatprep.subr.bf16.mxu1 %v2025_v52 }
  0xa4   :  { %1250 = vmatpush1.bf16.msra.mxu1 %v2030_v58 }
  0xa5   :  { %1252 = vmatprep.subr.bf16.mxu1 %v2033_v60 }
  0xa8   :  { %1254 = vmatpush1.bf16.msra.mxu1 %v2038_v63 }
  0xa9   :  { %1256 = vmatprep.subr.bf16.mxu1 %v1889_v4 }
 0x10f   :  { %v184_v6 = vpop.f32.mrb[0].mxu0 }
 0x110   :  { %v186_v7 = vpop.f32.mrb[1].mxu0  ;;  %v185_v25 = vadd.f32 %v184_v6, %v2102_v23  ;;  %v62_v6 = vld [vmem:[%s2336_s0 + $0x20] sm:$0xff] }
 0x111   :  { %v187_v28 = vadd.f32 %v186_v7, %v2104_v24  ;;  %1077 = vmatmul.mubr.msk.f32.gmra.mrb[8].mxu0 %vm86_vm3, %v62_v6  ;;  %v63_v7 = vld [vmem:[%s2336_s0 + $0x28] sm:$0xff] }
 0x112   :  { %212 = vmatprep.mubr.f32.mxu0 %v1815_v0 }
 0x115   :  { %1078 = vmatmul.mubr.msk.f32.gmra.mrb[10].mxu0 %vm86_vm3, %v63_v7 }
 0x116   :  { %v190_v41 = vpop.f32.mrb[2].mxu0  ;;  %218 = vmatprep.mubr.f32.mxu0 %v1815_v0 }
 0x117   :  { %v192_v42 = vpop.f32.mrb[3].mxu0  ;;  %v191_v47 = vadd.f32 %v190_v41, %v2102_v23 }
 0x118   :  { %v193_v49 = vadd.f32 %v192_v42, %v2104_v24 }
 0x119   :  { %1079 = vmatmul.mubr.msk.f32.gmra.mrb[12].mxu0 %vm86_vm3, %v64_v10 }
 0x11a   :  { %v196_v62 = vpop.f32.mrb[4].mxu0  ;;  %224 = vmatprep.mubr.f32.mxu0 %v1815_v0 }
 0x11b   :  { %v198_v1 = vpop.f32.mrb[5].mxu0  ;;  %v197_v13 = vadd.f32 %v196_v62, %v2102_v23 }
 0x11c   :  { %v199_v16 = vadd.f32 %v198_v1, %v2104_v24 }
 0x13e   :  { %v381_v31 = vpop.f32.mrb[0].mxu1 }
 0x13f   :  { %v386_v34 = vadd.f32 %v381_v31, %v185_v25  ;;  %v383_v35 = vpop.f32.mrb[1].mxu1 }
 0x140   :  { %v387_v36 = vadd.f32 %v383_v35, %v187_v28  ;;  %v202_v35 = vpop.f32.mrb[6].mxu0 }
 0x141   :  { %v388_v40 = vmax.f32 %v386_v34, 0.0  ;;  %v203_v0 = vadd.f32 %v202_v35, %v2102_v23 }
 0x142   :  { %v389_v39 = vmax.f32 %v387_v36, 0.0  ;;  %v204_v36 = vpop.f32.mrb[7].mxu0 }
 0x144   :  { %456 = vmatprep.mubr.f32.mxu1 %v389_v39  ;;  %v65_v39 = vld [vmem:[%s2336_s0 + $0x38] sm:$0xff]  ;;  %s1817_s0 = smov [#allocation9]  }
 0x145   :  { %457 = vmatmul.mubr.f32.vlgmr.msra.gmra.mrb[2].mxu1 %v388_v40  ;;  %1080 = vmatmul.mubr.msk.f32.gmra.mrb[14].mxu0 %vm86_vm3, %v65_v39  ;;  %v205_v40 = vadd.f32 %v204_v36, %v2104_v24  ;;  %s1057_s20 = sshll.u32 %s1817_s0, 4  ;;  %s1058_s20 = int_to_ptr.vmem [resolvable:$true] %s1057_s20 }
 0x146   :  { %1258 = vmatpush1.bf16.msra.mxu1 %v1891_v8  ;;  %s1757_s21 = scalar_lea.vmem %s1058_s20, 256  ;;  %p1762_p3 = scmp.lt.s32.totalorder %s1058_s20, %s1058_s20 }
 0x147   :  { %1260 = vmatprep.subr.bf16.mxu1 %v1893_v9  ;;  %p1758_p2 = scmp.ne.s32.totalorder %s1058_s20, %s1757_s21  ;;  %p1763_p4 = scmp.lt.s32.totalorder %s1757_s21, %s1757_s21 }
 0x149   :  { %p1764_p5 = por %p1763_p4, %p1762_p3 }
 0x14a   :  { %1262 = vmatpush1.bf16.msra.mxu1 %v1897_v14 }
 0x14b   :  { %1264 = vmatprep.subr.bf16.mxu1 %v1900_v15  ;;  %p1765_p6 = pnand %p1764_p5, %p1758_p2 }
 0x14e   :  { %1266 = vmatpush1.bf16.msra.mxu1 %v1903_v20 }
 0x14f   :  { %1268 = vmatprep.subr.bf16.mxu1 %v1906_v21 }
 0x152   :  { %1270 = vmatpush1.bf16.msra.mxu1 %v1909_v26 }
 0x153   :  { %1272 = vmatprep.subr.bf16.mxu1 %v1912_v27 }
 0x156   :  { %1274 = vmatpush1.bf16.msra.mxu1 %v1915_v32 }
 0x157   :  { %1276 = vmatprep.subr.bf16.mxu1 %v1918_v33 }
 0x15a   :  { %1278 = vmatpush1.bf16.msra.mxu1 %v1933_v43 }
 0x15b   :  { %1280 = vmatprep.subr.bf16.mxu1 %v1943_v48 }
 0x15e   :  { %1282 = vmatpush1.bf16.msra.mxu1 %v1955_v57 }
 0x15f   :  { %1284 = vmatprep.subr.bf16.mxu1 %v1963_v59 }
 0x162   :  { %1286 = vmatpush1.bf16.msra.mxu1 %v1972_v2 }
 0x163   :  { %1288 = vmatprep.subr.bf16.mxu1 %v1975_v3 }
 0x166   :  { %1290 = vmatpush1.bf16.msra.mxu1 %v1982_v11 }
 0x167   :  { %1292 = vmatprep.subr.bf16.mxu1 %v1985_v12 }
 0x16a   :  { %1294 = vmatpush1.bf16.msra.mxu1 %v1990_v19 }
 0x16b   :  { %1296 = vmatprep.subr.bf16.mxu1 %v1993_v22 }
 0x16e   :  { %1298 = vmatpush1.bf16.msra.mxu1 %v1998_v29 }
 0x16f   :  { %1300 = vmatprep.subr.bf16.mxu1 %v2001_v30 }
 0x172   :  { %1302 = vmatpush1.bf16.msra.mxu1 %v2006_v37 }
 0x173   :  { %1304 = vmatprep.subr.bf16.mxu1 %v2009_v38 }
 0x176   :  { %1306 = vmatpush1.bf16.msra.mxu1 %v2014_v44 }
 0x177   :  { %1308 = vmatprep.subr.bf16.mxu1 %v2017_v45 }
 0x17a   :  { %1310 = vmatpush1.bf16.msra.mxu1 %v2022_v51 }
 0x17b   :  { %1312 = vmatprep.subr.bf16.mxu1 %v2025_v52 }
 0x17e   :  { %1314 = vmatpush1.bf16.msra.mxu1 %v2030_v58 }
 0x17f   :  { %1316 = vmatprep.subr.bf16.mxu1 %v2033_v60 }
 0x182   :  { %1318 = vmatpush1.bf16.msra.mxu1 %v2038_v63 }
 0x183   :  { %1320 = vmatprep.subr.bf16.mxu1 %v1889_v4 }
 0x218   :  { %v458_v50 = vpop.f32.mrb[2].mxu1 }
 0x219   :  { %v463_v53 = vadd.f32 %v458_v50, %v191_v47  ;;  %v460_v54 = vpop.f32.mrb[3].mxu1 }
 0x21a   :  { %v464_v55 = vadd.f32 %v460_v54, %v193_v49 }
 0x21b   :  { %v465_v61 = vmax.f32 %v463_v53, 0.0 }
 0x21c   :  { %v466_v56 = vmax.f32 %v464_v55, 0.0 }
 0x21e   :  { %533 = vmatprep.mubr.f32.mxu1 %v466_v56 }
 0x21f   :  { %534 = vmatmul.mubr.f32.vlgmr.msra.gmra.mrb[4].mxu1 %v465_v61 }
 0x220   :  { %1322 = vmatpush1.bf16.msra.mxu1 %v1891_v8 }
 0x221   :  { %1324 = vmatprep.subr.bf16.mxu1 %v1893_v9 }
 0x224   :  { %1326 = vmatpush1.bf16.msra.mxu1 %v1897_v14 }
 0x225   :  { %1328 = vmatprep.subr.bf16.mxu1 %v1900_v15 }
 0x228   :  { %1330 = vmatpush1.bf16.msra.mxu1 %v1903_v20 }
 0x229   :  { %1332 = vmatprep.subr.bf16.mxu1 %v1906_v21 }
 0x22c   :  { %1334 = vmatpush1.bf16.msra.mxu1 %v1909_v26 }
 0x22d   :  { %1336 = vmatprep.subr.bf16.mxu1 %v1912_v27 }
 0x230   :  { %1338 = vmatpush1.bf16.msra.mxu1 %v1915_v32 }
 0x231   :  { %1340 = vmatprep.subr.bf16.mxu1 %v1918_v33 }
 0x234   :  { %1342 = vmatpush1.bf16.msra.mxu1 %v1933_v43 }
 0x235   :  { %1344 = vmatprep.subr.bf16.mxu1 %v1943_v48 }
 0x238   :  { %1346 = vmatpush1.bf16.msra.mxu1 %v1955_v57 }
 0x239   :  { %1348 = vmatprep.subr.bf16.mxu1 %v1963_v59 }
 0x23c   :  { %1350 = vmatpush1.bf16.msra.mxu1 %v1972_v2 }
 0x23d   :  { %1352 = vmatprep.subr.bf16.mxu1 %v1975_v3 }
 0x240   :  { %1354 = vmatpush1.bf16.msra.mxu1 %v1982_v11 }
 0x241   :  { %1356 = vmatprep.subr.bf16.mxu1 %v1985_v12 }
 0x244   :  { %1358 = vmatpush1.bf16.msra.mxu1 %v1990_v19 }
 0x245   :  { %1360 = vmatprep.subr.bf16.mxu1 %v1993_v22 }
 0x248   :  { %1362 = vmatpush1.bf16.msra.mxu1 %v1998_v29 }
 0x249   :  { %1364 = vmatprep.subr.bf16.mxu1 %v2001_v30 }
 0x24c   :  { %1366 = vmatpush1.bf16.msra.mxu1 %v2006_v37 }
 0x24d   :  { %1368 = vmatprep.subr.bf16.mxu1 %v2009_v38 }
 0x250   :  { %1370 = vmatpush1.bf16.msra.mxu1 %v2014_v44 }
 0x251   :  { %1372 = vmatprep.subr.bf16.mxu1 %v2017_v45 }
 0x254   :  { %1374 = vmatpush1.bf16.msra.mxu1 %v2022_v51 }
 0x255   :  { %1376 = vmatprep.subr.bf16.mxu1 %v2025_v52 }
 0x258   :  { %1378 = vmatpush1.bf16.msra.mxu1 %v2030_v58 }
 0x259   :  { %1380 = vmatprep.subr.bf16.mxu1 %v2033_v60 }
 0x25c   :  { %1382 = vmatpush1.bf16.msra.mxu1 %v2038_v63 }
 0x2f2   :  { %v535_v17 = vpop.f32.mrb[4].mxu1 }
 0x2f3   :  { %v540_v18 = vadd.f32 %v535_v17, %v197_v13  ;;  %v537_v25 = vpop.f32.mrb[5].mxu1  ;;  %v941_v17 = vld [vmem:[#allocation6 + $0x50] sm:$0xff] }
 0x2f4   :  { %v541_v28 = vadd.f32 %v537_v25, %v199_v16  ;;  %v959_v25 = vld [vmem:[#allocation6 + $0xe0] sm:$0xff] }
 0x2f5   :  { %v542_v34 = vmax.f32 %v540_v18, 0.0  ;;  %v942_v18 = vld [vmem:[#allocation6 + $0x58] sm:$0xff] }
 0x2f6   :  { %v543_v31 = vmax.f32 %v541_v28, 0.0  ;;  %v960_v28 = vld [vmem:[#allocation6 + $0xe8] sm:$0xff] }
 0x2f8   :  { %610 = vmatprep.mubr.f32.mxu1 %v543_v31  ;;  %v1661_v31 = vpack.c.bf16 %v942_v18, %v941_v17 }
 0x2f9   :  { %611 = vmatmul.mubr.f32.vlgmr.msra.gmra.mrb[6].mxu1 %v542_v34  ;;  %v1663_v34 = vpack.c.bf16 %v960_v28, %v959_v25 }
 0x3cc   :  { %v612_v41 = vpop.f32.mrb[6].mxu1 }
 0x3cd   :  { %v617_v42 = vadd.f32 %v612_v41, %v203_v0  ;;  %v614_v46 = vpop.f32.mrb[7].mxu1 }
 0x3ce   :  { %v618_v47 = vadd.f32 %v614_v46, %v205_v40  ;;  %v944_v46 = vld [vmem:[#allocation6 + $0x68] sm:$0xff] }
 0x3cf   :  { %v619_v50 = vmax.f32 %v617_v42, 0.0  ;;  %v943_v42 = vld [vmem:[#allocation6 + $0x60] sm:$0xff] }
 0x3d0   :  { %v620_v49 = vmax.f32 %v618_v47, 0.0  ;;  %v1665_v47 = vpack.c.bf16 %v944_v46, %v943_v42 }
 0x3d2   :  { %687 = vmatprep.mubr.f32.mxu0 %v620_v49  ;;  %v961_v49 = vld [vmem:[#allocation6 + $0xf0] sm:$0xff] }
 0x3d3   :  { %688 = vmatmul.mubr.f32.vlgmr.msra.gmra.mrb[8].mxu0 %v619_v50  ;;  %v962_v50 = vld [vmem:[#allocation6 + $0xf8] sm:$0xff] }
 0x3d4   :  { %1450 = vmatpush1.bf16.msra.mxu0 %v1891_v8 }
 0x3d5   :  { %1452 = vmatprep.subr.bf16.mxu0 %v1893_v9 }
 0x3d8   :  { %1454 = vmatpush1.bf16.msra.mxu0 %v1897_v14 }
 0x3d9   :  { %1456 = vmatprep.subr.bf16.mxu0 %v1900_v15 }
 0x3dc   :  { %1458 = vmatpush1.bf16.msra.mxu0 %v1903_v20 }
 0x3dd   :  { %1460 = vmatprep.subr.bf16.mxu0 %v1906_v21 }
 0x3e0   :  { %1462 = vmatpush1.bf16.msra.mxu0 %v1909_v26 }
 0x3e1   :  { %1464 = vmatprep.subr.bf16.mxu0 %v1912_v27 }
 0x3e4   :  { %1466 = vmatpush1.bf16.msra.mxu0 %v1915_v32 }
 0x3e5   :  { %1468 = vmatprep.subr.bf16.mxu0 %v1918_v33 }
 0x3e8   :  { %1470 = vmatpush1.bf16.msra.mxu0 %v1933_v43 }
 0x3e9   :  { %1472 = vmatprep.subr.bf16.mxu0 %v1943_v48 }
 0x3ec   :  { %1474 = vmatpush1.bf16.msra.mxu0 %v1955_v57 }
 0x3ed   :  { %1476 = vmatprep.subr.bf16.mxu0 %v1963_v59 }
 0x3f0   :  { %1478 = vmatpush1.bf16.msra.mxu0 %v1972_v2 }
 0x3f1   :  { %1480 = vmatprep.subr.bf16.mxu0 %v1975_v3 }
 0x3f4   :  { %1482 = vmatpush1.bf16.msra.mxu0 %v1982_v11 }
 0x3f5   :  { %1484 = vmatprep.subr.bf16.mxu0 %v1985_v12 }
 0x3f8   :  { %1486 = vmatpush1.bf16.msra.mxu0 %v1990_v19 }
 0x3f9   :  { %1488 = vmatprep.subr.bf16.mxu0 %v1993_v22 }
 0x3fc   :  { %1490 = vmatpush1.bf16.msra.mxu0 %v1998_v29 }
 0x3fd   :  { %1492 = vmatprep.subr.bf16.mxu0 %v2001_v30 }
 0x400   :  { %1494 = vmatpush1.bf16.msra.mxu0 %v2006_v37 }
 0x401   :  { %1496 = vmatprep.subr.bf16.mxu0 %v2009_v38 }
 0x404   :  { %1498 = vmatpush1.bf16.msra.mxu0 %v2014_v44 }
 0x405   :  { %1500 = vmatprep.subr.bf16.mxu0 %v2017_v45 }
 0x408   :  { %1502 = vmatpush1.bf16.msra.mxu0 %v2022_v51 }
 0x409   :  { %1504 = vmatprep.subr.bf16.mxu0 %v2025_v52 }
 0x40c   :  { %1506 = vmatpush1.bf16.msra.mxu0 %v2030_v58 }
 0x40d   :  { %1508 = vmatprep.subr.bf16.mxu0 %v2033_v60 }
 0x410   :  { %1510 = vmatpush1.bf16.msra.mxu0 %v2038_v63 }
 0x411   :  { %1512 = vmatprep.subr.bf16.mxu0 %v1889_v4 }
 0x4a6   :  { %v689_v53 = vpop.f32.mrb[8].mxu0 }
 0x4a7   :  { %v1687_v54 = vadd.f32 %v689_v53, %v2102_v23  ;;  %v691_v55 = vpop.f32.mrb[9].mxu0  ;;  %v1667_v53 = vpack.c.bf16 %v962_v50, %v961_v49 }
 0x4a8   :  { %v1688_v56 = vadd.f32 %v691_v55, %v2104_v24  ;;  %v946_v55 = vld [vmem:[#allocation6 + $0x78] sm:$0xff] }
 0x4a9   :  { %v696_v62 = vmax.f32 %v1687_v54, 0.0  ;;  %v945_v54 = vld [vmem:[#allocation6 + $0x70] sm:$0xff] }
 0x4aa   :  { %v697_v61 = vmax.f32 %v1688_v56, 0.0  ;;  %v1669_v56 = vpack.c.bf16 %v946_v55, %v945_v54 }
 0x4ac   :  { %764 = vmatprep.mubr.f32.mxu0 %v697_v61 }
 0x4ad   :  { %765 = vmatmul.mubr.f32.vlgmr.msra.gmra.mrb[10].mxu0 %v696_v62 }
 0x4ae   :  { %1514 = vmatpush1.bf16.msra.mxu0 %v1891_v8 }
 0x4af   :  { %1516 = vmatprep.subr.bf16.mxu0 %v1893_v9 }
 0x4b2   :  { %1518 = vmatpush1.bf16.msra.mxu0 %v1897_v14 }
 0x4b3   :  { %1520 = vmatprep.subr.bf16.mxu0 %v1900_v15 }
 0x4b6   :  { %1522 = vmatpush1.bf16.msra.mxu0 %v1903_v20 }
 0x4b7   :  { %1524 = vmatprep.subr.bf16.mxu0 %v1906_v21 }
 0x4ba   :  { %1526 = vmatpush1.bf16.msra.mxu0 %v1909_v26 }
 0x4bb   :  { %1528 = vmatprep.subr.bf16.mxu0 %v1912_v27 }
 0x4be   :  { %1530 = vmatpush1.bf16.msra.mxu0 %v1915_v32 }
 0x4bf   :  { %1532 = vmatprep.subr.bf16.mxu0 %v1918_v33 }
 0x4c2   :  { %1534 = vmatpush1.bf16.msra.mxu0 %v1933_v43 }
 0x4c3   :  { %1536 = vmatprep.subr.bf16.mxu0 %v1943_v48 }
 0x4c6   :  { %1538 = vmatpush1.bf16.msra.mxu0 %v1955_v57 }
 0x4c7   :  { %1540 = vmatprep.subr.bf16.mxu0 %v1963_v59 }
 0x4ca   :  { %1542 = vmatpush1.bf16.msra.mxu0 %v1972_v2 }
 0x4cb   :  { %1544 = vmatprep.subr.bf16.mxu0 %v1975_v3 }
 0x4ce   :  { %1546 = vmatpush1.bf16.msra.mxu0 %v1982_v11 }
 0x4cf   :  { %1548 = vmatprep.subr.bf16.mxu0 %v1985_v12 }
 0x4d2   :  { %1550 = vmatpush1.bf16.msra.mxu0 %v1990_v19 }
 0x4d3   :  { %1552 = vmatprep.subr.bf16.mxu0 %v1993_v22 }
 0x4d6   :  { %1554 = vmatpush1.bf16.msra.mxu0 %v1998_v29 }
 0x4d7   :  { %1556 = vmatprep.subr.bf16.mxu0 %v2001_v30 }
 0x4da   :  { %1558 = vmatpush1.bf16.msra.mxu0 %v2006_v37 }
 0x4db   :  { %1560 = vmatprep.subr.bf16.mxu0 %v2009_v38 }
 0x4de   :  { %1562 = vmatpush1.bf16.msra.mxu0 %v2014_v44 }
 0x4df   :  { %1564 = vmatprep.subr.bf16.mxu0 %v2017_v45 }
 0x4e2   :  { %1566 = vmatpush1.bf16.msra.mxu0 %v2022_v51 }
 0x4e3   :  { %1568 = vmatprep.subr.bf16.mxu0 %v2025_v52 }
 0x4e6   :  { %1570 = vmatpush1.bf16.msra.mxu0 %v2030_v58 }
 0x4e7   :  { %1572 = vmatprep.subr.bf16.mxu0 %v2033_v60 }
 0x4ea   :  { %1574 = vmatpush1.bf16.msra.mxu0 %v2038_v63 }
 0x4eb   :  { %1576 = vmatprep.subr.bf16.mxu0 %v1889_v4  ;;  %v947_v4 = vld [vmem:[#allocation6 + $0x80] sm:$0xff] }
 0x580   :  { %v766_v1 = vpop.f32.mrb[10].mxu0 }
 0x581   :  { %v1689_v5 = vadd.f32 %v766_v1, %v2102_v23  ;;  %v768_v6 = vpop.f32.mrb[11].mxu0 }
 0x582   :  { %v1690_v7 = vadd.f32 %v768_v6, %v2104_v24 }
 0x583   :  { %v773_v13 = vmax.f32 %v1689_v5, 0.0 }
 0x584   :  { %v774_v10 = vmax.f32 %v1690_v7, 0.0 }
 0x586   :  { %841 = vmatprep.mubr.f32.mxu0 %v774_v10 }
 0x587   :  { %842 = vmatmul.mubr.f32.vlgmr.msra.gmra.mrb[12].mxu0 %v773_v13 }
 0x588   :  { %1578 = vmatpush1.bf16.msra.mxu0 %v1891_v8  ;;  %v948_v8 = vld [vmem:[#allocation6 + $0x88] sm:$0xff] }
 0x589   :  { %1580 = vmatprep.subr.bf16.mxu0 %v1893_v9  ;;  %v931_v9 = vld [vmem:[#allocation6] sm:$0xff] }
 0x58c   :  { %1582 = vmatpush1.bf16.msra.mxu0 %v1897_v14  ;;  %v1639_v14 = vpack.c.bf16 %v948_v8, %v947_v4 }
 0x58d   :  { %1584 = vmatprep.subr.bf16.mxu0 %v1900_v15  ;;  %v932_v15 = vld [vmem:[#allocation6 + $0x8] sm:$0xff] }
 0x58e   :  { %1640 = vmatprep.subr.bf16.mxu1 %v1639_v14 }
 0x590   :  { %1586 = vmatpush1.bf16.msra.mxu0 %v1903_v20  ;;  %v949_v20 = vld [vmem:[#allocation6 + $0x90] sm:$0xff] }
 0x591   :  { %1588 = vmatprep.subr.bf16.mxu0 %v1906_v21  ;;  %v950_v21 = vld [vmem:[#allocation6 + $0x98] sm:$0xff] }
 0x594   :  { %1590 = vmatpush1.bf16.msra.mxu0 %v1909_v26  ;;  %v1641_v26 = vpack.c.bf16 %v932_v15, %v931_v9 }
 0x595   :  { %1592 = vmatprep.subr.bf16.mxu0 %v1912_v27  ;;  %v1643_v27 = vpack.c.bf16 %v950_v21, %v949_v20 }
 0x596   :  { %1642 = vmatpush3.bf16.msra.mxu1 %v1641_v26 }
 0x597   :  { %1644 = vmatprep.subr.bf16.mxu1 %v1643_v27 }
 0x598   :  { %1594 = vmatpush1.bf16.msra.mxu0 %v1915_v32  ;;  %v933_v32 = vld [vmem:[#allocation6 + $0x10] sm:$0xff] }
 0x599   :  { %1596 = vmatprep.subr.bf16.mxu0 %v1918_v33  ;;  %v934_v33 = vld [vmem:[#allocation6 + $0x18] sm:$0xff] }
 0x59c   :  { %1598 = vmatpush1.bf16.msra.mxu0 %v1933_v43  ;;  %v951_v43 = vld [vmem:[#allocation6 + $0xa0] sm:$0xff] }
 0x59d   :  { %1600 = vmatprep.subr.bf16.mxu0 %v1943_v48  ;;  %v952_v48 = vld [vmem:[#allocation6 + $0xa8] sm:$0xff] }
 0x5a0   :  { %1602 = vmatpush1.bf16.msra.mxu0 %v1955_v57  ;;  %v1645_v57 = vpack.c.bf16 %v934_v33, %v933_v32 }
 0x5a1   :  { %1604 = vmatprep.subr.bf16.mxu0 %v1963_v59  ;;  %v1647_v59 = vpack.c.bf16 %v952_v48, %v951_v43 }
 0x5a2   :  { %1646 = vmatpush3.bf16.msra.mxu1 %v1645_v57 }
 0x5a3   :  { %1648 = vmatprep.subr.bf16.mxu1 %v1647_v59 }
 0x5a4   :  { %1606 = vmatpush1.bf16.msra.mxu0 %v1972_v2  ;;  %v935_v2 = vld [vmem:[#allocation6 + $0x20] sm:$0xff] }
 0x5a5   :  { %1608 = vmatprep.subr.bf16.mxu0 %v1975_v3  ;;  %v936_v3 = vld [vmem:[#allocation6 + $0x28] sm:$0xff] }
 0x5a8   :  { %1610 = vmatpush1.bf16.msra.mxu0 %v1982_v11  ;;  %v953_v11 = vld [vmem:[#allocation6 + $0xb0] sm:$0xff] }
 0x5a9   :  { %1612 = vmatprep.subr.bf16.mxu0 %v1985_v12  ;;  %v954_v12 = vld [vmem:[#allocation6 + $0xb8] sm:$0xff] }
 0x5ac   :  { %1614 = vmatpush1.bf16.msra.mxu0 %v1990_v19  ;;  %v1649_v19 = vpack.c.bf16 %v936_v3, %v935_v2 }
 0x5ad   :  { %1616 = vmatprep.subr.bf16.mxu0 %v1993_v22  ;;  %v1651_v22 = vpack.c.bf16 %v954_v12, %v953_v11 }
 0x5ae   :  { %1650 = vmatpush3.bf16.msra.mxu1 %v1649_v19 }
 0x5af   :  { %1652 = vmatprep.subr.bf16.mxu1 %v1651_v22 }
 0x5b0   :  { %1618 = vmatpush1.bf16.msra.mxu0 %v1998_v29  ;;  %v937_v29 = vld [vmem:[#allocation6 + $0x30] sm:$0xff] }
 0x5b1   :  { %1620 = vmatprep.subr.bf16.mxu0 %v2001_v30  ;;  %v938_v30 = vld [vmem:[#allocation6 + $0x38] sm:$0xff] }
 0x5b4   :  { %1622 = vmatpush1.bf16.msra.mxu0 %v2006_v37  ;;  %v955_v37 = vld [vmem:[#allocation6 + $0xc0] sm:$0xff] }
 0x5b5   :  { %1624 = vmatprep.subr.bf16.mxu0 %v2009_v38  ;;  %v956_v38 = vld [vmem:[#allocation6 + $0xc8] sm:$0xff] }
 0x5b8   :  { %1626 = vmatpush1.bf16.msra.mxu0 %v2014_v44  ;;  %v1653_v44 = vpack.c.bf16 %v938_v30, %v937_v29 }
 0x5b9   :  { %1628 = vmatprep.subr.bf16.mxu0 %v2017_v45  ;;  %v1655_v45 = vpack.c.bf16 %v956_v38, %v955_v37 }
 0x5ba   :  { %1654 = vmatpush3.bf16.msra.mxu1 %v1653_v44 }
 0x5bb   :  { %1656 = vmatprep.subr.bf16.mxu1 %v1655_v45 }
 0x5bc   :  { %1630 = vmatpush1.bf16.msra.mxu0 %v2022_v51  ;;  %v939_v51 = vld [vmem:[#allocation6 + $0x40] sm:$0xff] }
 0x5bd   :  { %1632 = vmatprep.subr.bf16.mxu0 %v2025_v52  ;;  %v940_v52 = vld [vmem:[#allocation6 + $0x48] sm:$0xff] }
 0x5c0   :  { %1634 = vmatpush1.bf16.msra.mxu0 %v2030_v58  ;;  %v957_v58 = vld [vmem:[#allocation6 + $0xd0] sm:$0xff] }
 0x5c1   :  { %1636 = vmatprep.subr.bf16.mxu0 %v2033_v60  ;;  %v958_v60 = vld [vmem:[#allocation6 + $0xd8] sm:$0xff] }
 0x5c2   :  { %v1659_v16 = vpack.c.bf16 %v958_v60, %v957_v58 }
 0x5c4   :  { %1638 = vmatpush1.bf16.msra.mxu0 %v2038_v63  ;;  %v1657_v63 = vpack.c.bf16 %v940_v52, %v939_v51 }
 0x5c6   :  { %1658 = vmatpush3.bf16.msra.mxu1 %v1657_v63 }
 0x5c7   :  { %1660 = vmatprep.subr.bf16.mxu1 %v1659_v16 }
 0x5ca   :  { %1662 = vmatpush3.bf16.msra.mxu1 %v1661_v31 }
 0x5cb   :  { %1664 = vmatprep.subr.bf16.mxu1 %v1663_v34 }
 0x5ce   :  { %1666 = vmatpush3.bf16.msra.mxu1 %v1665_v47 }
 0x5cf   :  { %1668 = vmatprep.subr.bf16.mxu1 %v1667_v53 }
 0x5d2   :  { %1670 = vmatpush3.bf16.msra.mxu1 %v1669_v56 }
 0x65a   :  { %v843_v35 = vpop.f32.mrb[12].mxu0 }
 0x65b   :  { %v1691_v36 = vadd.f32 %v843_v35, %v2102_v23  ;;  %v845_v39 = vpop.f32.mrb[13].mxu0 }
 0x65c   :  { %v1692_v0 = vadd.f32 %v845_v39, %v2104_v24 }
 0x65d   :  { %v850_v41 = vmax.f32 %v1691_v36, 0.0 }
 0x65e   :  { %v851_v40 = vmax.f32 %v1692_v0, 0.0 }
 0x660   :  { %918 = vmatprep.mubr.f32.mxu0 %v851_v40 }
 0x661   :  { %919 = vmatmul.mubr.f32.vlgmr.msra.gmra.mrb[14].mxu0 %v850_v41 }
 0x734   :  { %v920_v61 = vpop.f32.mrb[14].mxu0 }
 0x735   :  { %v1693_v62 = vadd.f32 %v920_v61, %v2102_v23  ;;  %v922_v1 = vpop.f32.mrb[15].mxu0 }
 0x736   :  { %v1694_v5 = vadd.f32 %v922_v1, %v2104_v24 }
 0x737   :  { %v927_v6 = vmax.f32 %v1693_v62, 0.0 }
 0x738   :  { %v928_v7 = vmax.f32 %v1694_v5, 0.0 }
 0x739   :  { %929 = vst [vmem:[#allocation9] sm:$0xff] %v927_v6 }
 0x73a   :  { %930 = vst [vmem:[#allocation9 + $0x8] sm:$0xff] %v928_v7  ;;  %1034 = vmatprep.mubr.f32.mxu1 %v928_v7 }
 0x73b   :  { %1035 = vmatmul.mubr.f32.vlgmr.msra.gmra.mrb[8].mxu1 %v927_v6 }
 0x73c   :  { %1768 = shalt.err (!%p1765_p6)
}
 0x73d   :  { %s1769_s24 = scalar_lea.hbm %s2344_s8, 256 }
 0x73e   :  { %p1770_p7 = scmp.ne.s32.totalorder %s2344_s8, %s1769_s24  ;;  %p1773_p8 = scmp.lt.u32.totalorder %s1769_s24, %s2344_s8 }
 0x740   :  { %p1775_p9 = pnand %p1773_p8, %p1770_p7 }
 0x742   :  { %1778 = shalt.err (!%p1775_p9)
}
 0x743   :  { %1060 = dma.vmem_to_hbm [thread:$0]  %s1058_s20, 256, %s2344_s8, [#allocation10]   ;;  %v1081_v24 = vld [vmem:[%s2342_s6] ss:$0 sm:$0xff] }
 0x744   :  { %s1818_s30 = smov [#allocation8]  }
 0x745   :  { %s1047_s9 = sshll.u32 %s1818_s30, 4  ;;  %s1048_s9 = int_to_ptr.vmem [resolvable:$true] %s1047_s9 }
 0x746   :  { %s1779_s4 = scalar_lea.vmem %s1048_s9, 128  ;;  %p1784_p11 = scmp.lt.s32.totalorder %s1048_s9, %s1048_s9 }
 0x747   :  { %p1780_p10 = scmp.ne.s32.totalorder %s1048_s9, %s1779_s4  ;;  %p1785_p12 = scmp.lt.s32.totalorder %s1779_s4, %s1779_s4 }
 0x749   :  { %p1786_p13 = por %p1785_p12, %p1784_p11 }
 0x74b   :  { %p1787_p0 = pnand %p1786_p13, %p1780_p10 }
 0x80e   :  { %v1114_v23 = vpop.f32.mrb[8].mxu1 }
 0x80f   :  { %v1115_v10 = vpop.f32.mrb[9].mxu1 }
 0x810   :  { %v1116_v13 = vadd.f32 %v1115_v10, %v1114_v23 }
 0x812   :  { %v1037_v4 = vadd.f32 %v1116_v13, %v1081_v24 }
 0x814   :  { %1040 = vst [vmem:[#allocation8] sm:$0xff] %v1037_v4 }
 0x815   :  { %1790 = shalt.err (!%p1787_p0)
}
 0x816   :  { %s1791_s10 = scalar_lea.hbm %s2343_s7, 128 }
 0x817   :  { %p1792_p1 = scmp.ne.s32.totalorder %s2343_s7, %s1791_s10  ;;  %p1795_p2 = scmp.lt.u32.totalorder %s1791_s10, %s2343_s7 }
 0x819   :  { %p1797_p3 = pnand %p1795_p2, %p1792_p1 }
 0x81b   :  { %1800 = shalt.err (!%p1797_p3)
}
 0x81c   :  { %1050 = dma.vmem_to_hbm [thread:$0]  %s1048_s9, 128, %s2343_s7, [#allocation5]  }
 0x81d   :  { %1805 = dma.done.wait [#allocation5], 128  }
 0x81e   :  { %1806 = vsyncadd [#allocation5], 4294967168 }
 0x81f   :  { %1807 = dma.done.wait [#allocation10], 256  }
 0x820   :  { %1808 = vsyncadd [#allocation10], 4294967040 }
 0x821   :  { %1067 = vsyncpa [#allocation4], 1 }
 0x822   :  { %1068 = vsyncpa [#allocation7], 1 }
 0x823   :  { %1069 = vsyncpa [#allocation5], 1 }
 0x824   :  { %1070 = vsyncpa [#allocation10], 1 }

</bundles_post_ra>
